<compile_context>
chip_gen: v7x
topology: tpu7x:2x2x1
jax: 0.10.0
libtpu: 0.0.40
codegen_flags: <defaults>
</compile_context>

<pallas_src>
import functools
import math

import jax
import jax.numpy as jnp
from jax.experimental import pallas as pl
from jax.experimental.pallas import tpu as pltpu

_LANES = 128


def _round_up(x, m):
    return (x + m - 1) // m * m


def _condition_policy_kernel(max_action,
                             x_ref,
                             w1_ref, b1_ref,
                             w2_ref, b2_ref,
                             w3_ref, b3_ref,
                             out_ref):
    # Stage 1: fused fco/fca (block-diagonal weight), bias, relu.
    h = jnp.dot(x_ref[...], w1_ref[...], preferred_element_type=jnp.float32)
    h = jnp.maximum(h + b1_ref[...], 0.0)

    # Stage 2: fc layer; [[Wfc],[Wfc]] folds the relu-branch sum into the dot.
    z = jnp.dot(h.astype(jnp.bfloat16), w2_ref[...],
                preferred_element_type=jnp.float32)
    z = jnp.maximum(z + b2_ref[...], 0.0)

    # Stage 3: output head, tanh, scale (padded lanes stay exactly 0).
    y = jnp.dot(z.astype(jnp.bfloat16), w3_ref[...],
                preferred_element_type=jnp.float32)
    y = max_action * jnp.tanh(y + b3_ref[...])

    out_ref[...] = y.astype(out_ref.dtype)


@functools.partial(jax.jit, static_argnames=("max_action", "block_b"))
def condition_policy_forward(o, a_other, params, *, max_action, block_b=512):
    """Fused Pallas forward pass.

    o:        (B, obs_dim)     float32
    a_other:  (B, a_other_dim) float32
    params:   dict of per-layer weights (in, out) and biases (1, out), f32
    returns:  (B, act_dim)     float32
    """
    B, obs_dim = o.shape
    a_dim = a_other.shape[1]
    hidden = params["wo"].shape[1]           # 64
    act_dim = params["wout"].shape[1]

    k_in = obs_dim + a_dim
    k_pad = _round_up(k_in, 8)               # sublane-aligned K
    h2 = _round_up(2 * hidden, _LANES)       # 128 for hidden=64
    out_pad = _round_up(act_dim, _LANES)     # 128 -> lane-dense stores

    f32 = jnp.float32

    # ---- pack / pad parameters (wrapper-side, cheap XLA ops) ----
    w1 = jnp.zeros((k_pad, h2), f32)
    w1 = w1.at[:obs_dim, :hidden].set(params["wo"].astype(f32))
    w1 = w1.at[obs_dim:k_in, hidden:2 * hidden].set(params["wa"].astype(f32))
    b1 = jnp.zeros((1, h2), f32)
    b1 = b1.at[:, :hidden].set(params["bo"].reshape(1, hidden).astype(f32))
    b1 = b1.at[:, hidden:2 * hidden].set(params["ba"].reshape(1, hidden).astype(f32))

    w2 = jnp.zeros((h2, h2), f32)
    w2 = w2.at[:hidden, :hidden].set(params["wfc"].astype(f32))
    w2 = w2.at[hidden:2 * hidden, :hidden].set(params["wfc"].astype(f32))
    b2 = jnp.zeros((1, h2), f32)
    b2 = b2.at[:, :hidden].set(params["bfc"].reshape(1, hidden).astype(f32))

    w3 = jnp.zeros((h2, out_pad), f32)
    w3 = w3.at[:hidden, :act_dim].set(params["wout"].astype(f32))
    b3 = jnp.zeros((1, out_pad), f32)
    b3 = b3.at[:, :act_dim].set(params["bout"].reshape(1, act_dim).astype(f32))

    w1 = w1.astype(jnp.bfloat16)
    w2 = w2.astype(jnp.bfloat16)
    w3 = w3.astype(jnp.bfloat16)

    # ---- pack / pad the streamed activations ----
    x = jnp.concatenate([o.astype(f32), a_other.astype(f32)], axis=1)
    tb = min(block_b, _round_up(B, 8))       # batch tile (block_b must be %8)
    b_padded = _round_up(B, tb)
    x = jnp.pad(x, ((0, b_padded - B), (0, k_pad - k_in)))
    x = x.astype(jnp.bfloat16)

    kernel = functools.partial(_condition_policy_kernel, float(max_action))

    out_padded = pl.pallas_call(
        kernel,
        out_shape=jax.ShapeDtypeStruct((b_padded, out_pad), jnp.float32),
        grid=(b_padded // tb,),
        in_specs=[
            pl.BlockSpec((tb, k_pad), lambda i: (i, 0)),      # activations
            pl.BlockSpec((k_pad, h2), lambda i: (0, 0)),      # W1 (resident)
            pl.BlockSpec((1, h2), lambda i: (0, 0)),          # b1
            pl.BlockSpec((h2, h2), lambda i: (0, 0)),         # W2
            pl.BlockSpec((1, h2), lambda i: (0, 0)),          # b2
            pl.BlockSpec((h2, out_pad), lambda i: (0, 0)),    # W3
            pl.BlockSpec((1, out_pad), lambda i: (0, 0)),     # b3
        ],
        out_specs=pl.BlockSpec((tb, out_pad), lambda i: (i, 0)),
        compiler_params=pltpu.CompilerParams(
            dimension_semantics=("parallel",)),
    )(x, w1, b1, w2, b2, w3, b3)

    return out_padded[:B, :act_dim]


def init_linear(key, fan_in, fan_out):
    """torch.nn.Linear default init (uniform +/- 1/sqrt(fan_in)).
    Weight stored as (fan_in, fan_out), bias as (1, fan_out)."""
    kw, kb = jax.random.split(key)
    bound = 1.0 / math.sqrt(fan_in)
    w = jax.random.uniform(kw, (fan_in, fan_out), jnp.float32, -bound, bound)
    b = jax.random.uniform(kb, (1, fan_out), jnp.float32, -bound, bound)
    return w, b


if __name__ == "__main__":
    # Config implied by the module: obs_shape[agent_id]=16, action_shape=4,
    # n_agents=3 -> a_other dim = 4*(3-1)=8, hidden=64, high_action=1.0.
    batch = 8
    obs_dim = 16
    act_dim = 4
    n_agents = 3
    a_other_dim = act_dim * (n_agents - 1)
    hidden = 64
    max_action = 1.0

    key = jax.random.PRNGKey(0)
    k_o, k_a, k_fco, k_fca, k_fc, k_out = jax.random.split(key, 6)

    o = jax.random.normal(k_o, (batch, obs_dim), jnp.float32)
    a_other = jax.random.normal(k_a, (batch, a_other_dim), jnp.float32)

    wo, bo = init_linear(k_fco, obs_dim, hidden)
    wa, ba = init_linear(k_fca, a_other_dim, hidden)
    wfc, bfc = init_linear(k_fc, hidden, hidden)
    wout, bout = init_linear(k_out, hidden, act_dim)

    params = dict(wo=wo, bo=bo, wa=wa, ba=ba,
                  wfc=wfc, bfc=bfc, wout=wout, bout=bout)

    actions = condition_policy_forward(o, a_other, params,
                                       max_action=max_action)
    actions = jax.block_until_ready(actions)
    assert actions.shape == (batch, act_dim)

    # Quantization-aware reference: same math with the same bf16 rounding
    # points as the kernel (weights, streamed input, inter-layer activations).
    bf = lambda t: t.astype(jnp.bfloat16).astype(jnp.float32)
    ho = jnp.maximum(bf(o) @ bf(wo) + bo, 0.0)
    ha = jnp.maximum(bf(a_other) @ bf(wa) + ba, 0.0)
    xq = jnp.maximum(bf(ho) @ bf(wfc) + bf(ha) @ bf(wfc) + bfc, 0.0)
    ref_q = max_action * jnp.tanh(bf(xq) @ bf(wout) + bout)
    assert jnp.allclose(actions, ref_q, atol=1e-3, rtol=1e-3), (
        float(jnp.max(jnp.abs(actions - ref_q))))

    # Full-precision (module-faithful) reference: loose check that the bf16
    # weight/activation storage stays close to the original f32 math.
    ho_f = jnp.maximum(o @ wo + bo, 0.0)
    ha_f = jnp.maximum(a_other @ wa + ba, 0.0)
    x_f = jnp.maximum((ho_f + ha_f) @ wfc + bfc, 0.0)
    ref_f = max_action * jnp.tanh(x_f @ wout + bout)
    assert jnp.allclose(actions, ref_f, atol=1e-1), (
        float(jnp.max(jnp.abs(actions - ref_f))))

    print("KERNEL_OK")
</pallas_src>

<mosaic_0001>
module attributes {stable_mosaic.version = 11 : i64} {
  func.func @_condition_policy_kernel(%arg0: i32, %arg1: memref<8x24xbf16, #tpu.memory_space<vmem>>, %arg2: memref<24x128xbf16, #tpu.memory_space<vmem>>, %arg3: memref<1x128xf32, #tpu.memory_space<vmem>>, %arg4: memref<128x128xbf16, #tpu.memory_space<vmem>>, %arg5: memref<1x128xf32, #tpu.memory_space<vmem>>, %arg6: memref<128x128xbf16, #tpu.memory_space<vmem>>, %arg7: memref<1x128xf32, #tpu.memory_space<vmem>>, %arg8: memref<8x128xf32, #tpu.memory_space<vmem>>) attributes {dimension_semantics = [#tpu.dimension_semantics<parallel>], iteration_bounds = array<i64: 1>, scalar_prefetch = 0 : i64, scratch_operands = 0 : i64, tpu.core_type = #tpu.core_type<tc>, window_params = [{transform_indices = @transform_0, window_bounds = array<i64: 8, 24>}, {pipeline_mode = #tpu.pipeline_mode<synchronous>, transform_indices = @transform_1, window_bounds = array<i64: 24, 128>}, {pipeline_mode = #tpu.pipeline_mode<synchronous>, transform_indices = @transform_2, window_bounds = array<i64: 1, 128>}, {pipeline_mode = #tpu.pipeline_mode<synchronous>, transform_indices = @transform_3, window_bounds = array<i64: 128, 128>}, {pipeline_mode = #tpu.pipeline_mode<synchronous>, transform_indices = @transform_4, window_bounds = array<i64: 1, 128>}, {pipeline_mode = #tpu.pipeline_mode<synchronous>, transform_indices = @transform_5, window_bounds = array<i64: 128, 128>}, {pipeline_mode = #tpu.pipeline_mode<synchronous>, transform_indices = @transform_6, window_bounds = array<i64: 1, 128>}, {transform_indices = @transform_7, window_bounds = array<i64: 8, 128>}]} {
    %c0 = arith.constant 0 : index
    %c0_0 = arith.constant 0 : index
    %0 = vector.load %arg1[%c0, %c0_0] : memref<8x24xbf16, #tpu.memory_space<vmem>>, vector<8x24xbf16>
    %c0_1 = arith.constant 0 : index
    %c0_2 = arith.constant 0 : index
    %1 = vector.load %arg2[%c0_1, %c0_2] : memref<24x128xbf16, #tpu.memory_space<vmem>>, vector<24x128xbf16>
    %cst = arith.constant dense<0.000000e+00> : vector<8x128xf32>
    %2 = tpu.matmul %0, %1, %cst {dimension_numbers = #tpu.dot_dimension_numbers<[1], [0], [0], [1], [0, 0, 1, 1], [], []>} : vector<8x24xbf16>, vector<24x128xbf16>, vector<8x128xf32> -> vector<8x128xf32>
    %c0_3 = arith.constant 0 : index
    %c0_4 = arith.constant 0 : index
    %3 = vector.load %arg3[%c0_3, %c0_4] : memref<1x128xf32, #tpu.memory_space<vmem>>, vector<1x128xf32>
    %4 = vector.broadcast %3 : vector<1x128xf32> to vector<8x128xf32>
    %5 = arith.addf %2, %4 : vector<8x128xf32>
    %cst_5 = arith.constant 0.000000e+00 : f32
    %6 = vector.broadcast %cst_5 : f32 to vector<8x128xf32>
    %7 = arith.maximumf %5, %6 : vector<8x128xf32>
    %8 = arith.truncf %7 : vector<8x128xf32> to vector<8x128xbf16>
    %c0_6 = arith.constant 0 : index
    %c0_7 = arith.constant 0 : index
    %9 = vector.load %arg4[%c0_6, %c0_7] : memref<128x128xbf16, #tpu.memory_space<vmem>>, vector<128x128xbf16>
    %cst_8 = arith.constant dense<0.000000e+00> : vector<8x128xf32>
    %10 = tpu.matmul %8, %9, %cst_8 {dimension_numbers = #tpu.dot_dimension_numbers<[1], [0], [0], [1], [0, 0, 1, 1], [], []>} : vector<8x128xbf16>, vector<128x128xbf16>, vector<8x128xf32> -> vector<8x128xf32>
    %c0_9 = arith.constant 0 : index
    %c0_10 = arith.constant 0 : index
    %11 = vector.load %arg5[%c0_9, %c0_10] : memref<1x128xf32, #tpu.memory_space<vmem>>, vector<1x128xf32>
    %12 = vector.broadcast %11 : vector<1x128xf32> to vector<8x128xf32>
    %13 = arith.addf %10, %12 : vector<8x128xf32>
    %cst_11 = arith.constant 0.000000e+00 : f32
    %14 = vector.broadcast %cst_11 : f32 to vector<8x128xf32>
    %15 = arith.maximumf %13, %14 : vector<8x128xf32>
    %16 = arith.truncf %15 : vector<8x128xf32> to vector<8x128xbf16>
    %c0_12 = arith.constant 0 : index
    %c0_13 = arith.constant 0 : index
    %17 = vector.load %arg6[%c0_12, %c0_13] : memref<128x128xbf16, #tpu.memory_space<vmem>>, vector<128x128xbf16>
    %cst_14 = arith.constant dense<0.000000e+00> : vector<8x128xf32>
    %18 = tpu.matmul %16, %17, %cst_14 {dimension_numbers = #tpu.dot_dimension_numbers<[1], [0], [0], [1], [0, 0, 1, 1], [], []>} : vector<8x128xbf16>, vector<128x128xbf16>, vector<8x128xf32> -> vector<8x128xf32>
    %c0_15 = arith.constant 0 : index
    %c0_16 = arith.constant 0 : index
    %19 = vector.load %arg7[%c0_15, %c0_16] : memref<1x128xf32, #tpu.memory_space<vmem>>, vector<1x128xf32>
    %20 = vector.broadcast %19 : vector<1x128xf32> to vector<8x128xf32>
    %21 = arith.addf %18, %20 : vector<8x128xf32>
    %22 = math.tanh %21 : vector<8x128xf32>
    %cst_17 = arith.constant 1.000000e+00 : f32
    %23 = vector.broadcast %cst_17 : f32 to vector<8x128xf32>
    %24 = arith.mulf %23, %22 : vector<8x128xf32>
    %c0_18 = arith.constant 0 : index
    %c0_19 = arith.constant 0 : index
    %25 = vector.load %arg8[%c0_18, %c0_19] : memref<8x128xf32, #tpu.memory_space<vmem>>, vector<8x128xf32>
    tpu.vector_store %arg8[%c0_18, %c0_19], %24 {strides = array<i32>} : memref<8x128xf32, #tpu.memory_space<vmem>>, vector<8x128xf32>,
    return
  }
  func.func @transform_0(%arg0: i32) -> (i32, i32) {
    %c0_i32 = arith.constant 0 : i32
    %c0_i32_0 = arith.constant 0 : i32
    return %arg0, %c0_i32 : i32, i32
  }
  func.func @transform_1(%arg0: i32) -> (i32, i32) {
    %c0_i32 = arith.constant 0 : i32
    %c0_i32_0 = arith.constant 0 : i32
    %c0_i32_1 = arith.constant 0 : i32
    return %c0_i32, %c0_i32_0 : i32, i32
  }
  func.func @transform_2(%arg0: i32) -> (i32, i32) {
    %c0_i32 = arith.constant 0 : i32
    %c0_i32_0 = arith.constant 0 : i32
    %c0_i32_1 = arith.constant 0 : i32
    return %c0_i32, %c0_i32_0 : i32, i32
  }
  func.func @transform_3(%arg0: i32) -> (i32, i32) {
    %c0_i32 = arith.constant 0 : i32
    %c0_i32_0 = arith.constant 0 : i32
    %c0_i32_1 = arith.constant 0 : i32
    return %c0_i32, %c0_i32_0 : i32, i32
  }
  func.func @transform_4(%arg0: i32) -> (i32, i32) {
    %c0_i32 = arith.constant 0 : i32
    %c0_i32_0 = arith.constant 0 : i32
    %c0_i32_1 = arith.constant 0 : i32
    return %c0_i32, %c0_i32_0 : i32, i32
  }
  func.func @transform_5(%arg0: i32) -> (i32, i32) {
    %c0_i32 = arith.constant 0 : i32
    %c0_i32_0 = arith.constant 0 : i32
    %c0_i32_1 = arith.constant 0 : i32
    return %c0_i32, %c0_i32_0 : i32, i32
  }
  func.func @transform_6(%arg0: i32) -> (i32, i32) {
    %c0_i32 = arith.constant 0 : i32
    %c0_i32_0 = arith.constant 0 : i32
    %c0_i32_1 = arith.constant 0 : i32
    return %c0_i32, %c0_i32_0 : i32, i32
  }
  func.func @transform_7(%arg0: i32) -> (i32, i32) {
    %c0_i32 = arith.constant 0 : i32
    %c0_i32_0 = arith.constant 0 : i32
    return %arg0, %c0_i32 : i32, i32
  }
}

</mosaic_0001>

<bundles_post_ra>
// kernel: condition_policy_forward.1
= control target key start
LH: loop header
LB: loop body
LE: loop exit
PB: predicated region body
PF: predicated region fallthrough
CT: control target
= control target key end

     0   :  { %v440_v0 = vmov 0.0   ;;  %vm51_vm0 = vcmask 1043456   ;;  %vm441_vm1 = vmmov 0   ;;  %vm47_vm2 = vcmask 195584   ;;  %s575_s1 = inlined_call_operand.vmem [shape: bf16[24,128], index: 1, kind: input, shape index: {}]   ;;  %s576_s3 = inlined_call_operand.vmem [shape: bf16[128,128], index: 3, kind: input, shape index: {}]   ;;  %s577_s0 = inlined_call_operand.vmem [shape: bf16[8,24], index: 0, kind: input, shape index: {}]   ;;  %s578_s5 = inlined_call_operand.vmem [shape: bf16[128,128], index: 5, kind: input, shape index: {}]   ;;  %s579_s2 = inlined_call_operand.vmem [shape: f32[1,128], index: 2, kind: input, shape index: {}]   ;;  %s580_s4 = inlined_call_operand.vmem [shape: f32[1,128], index: 4, kind: input, shape index: {}]   ;;  %s581_s6 = inlined_call_operand.vmem [shape: f32[1,128], index: 6, kind: input, shape index: {}]   ;;  %s582_s7 = inlined_call_operand.vmem [shape: f32[8,128], index: 7, kind: output, shape index: {}]  }
   0x1   :  { %370 = vmatprep.subr.bf16.mxu0 %v440_v0  ;;  %v420_v1 = vld [vmem:[%s575_s1] sm:$0xff]   ;;  %374 = vmatprep.mubr.msk.bf16.mxu0 %vm441_vm1, %v440_v0  ;;  %v421_v2 = vld [vmem:[%s575_s1 + $0x8] ss:$0 sps:$4 sm:$0xff]   ;;  %v424_v7 = vld [vmem:[%s576_s3 + $0x10] sm:$0xff]  }
   0x2   :  { %378 = vmatprep.subr.bf16.mxu1 %v440_v0  ;;  %394 = vmatprep.mubr.msk.bf16.mxu1 %vm441_vm1, %v440_v0  ;;  %v422_v3 = vld [vmem:[%s576_s3] sm:$0xff]   ;;  %v53_v4 = vsel %vm51_vm0, %v421_v2, 0  ;;  %v423_v5 = vld [vmem:[%s576_s3 + $0x8] sm:$0xff]   ;;  %v425_v8 = vld [vmem:[%s576_s3 + $0x18] sm:$0xff]  }
   0x3   :  { %371 = vmatpush3.bf16.msra.mxu0 %v420_v1  ;;  %379 = vmatpush3.bf16.msra.mxu1 %v422_v3  ;;  %v27_v6 = vld [vmem:[%s577_s0] sm:$0xf]  ;;  %v427_v10 = vld [vmem:[%s576_s3 + $0x28] sm:$0xff]   ;;  %v428_v11 = vld [vmem:[%s576_s3 + $0x30] sm:$0xff]  }
   0x4   :  { %372 = vmatprep.subr.bf16.mxu0 %v440_v0  ;;  %380 = vmatprep.subr.bf16.mxu1 %v440_v0  ;;  %v426_v9 = vld [vmem:[%s576_s3 + $0x20] sm:$0xff]   ;;  %v429_v12 = vld [vmem:[%s576_s3 + $0x38] sm:$0xff]   ;;  %v431_v14 = vld [vmem:[%s578_s5 + $0x8] sm:$0xff]  }
   0x5   :  { %v430_v13 = vld [vmem:[%s578_s5] sm:$0xff]   ;;  %v432_v15 = vld [vmem:[%s578_s5 + $0x10] sm:$0xff]   ;;  %v433_v16 = vld [vmem:[%s578_s5 + $0x18] sm:$0xff]  }
   0x6   :  { %v434_v17 = vld [vmem:[%s578_s5 + $0x20] sm:$0xff]   ;;  %v435_v18 = vld [vmem:[%s578_s5 + $0x28] sm:$0xff]   ;;  %v436_v27 = vld [vmem:[%s578_s5 + $0x30] sm:$0xff]  }
   0x7   :  { %373 = vmatpush3.bf16.msra.mxu0 %v53_v4  ;;  %381 = vmatpush3.bf16.msra.mxu1 %v423_v5  ;;  %v327_v19 = vld [vmem:[%s579_s2] ss:$0 sm:$0xff]  ;;  %v437_v28 = vld [vmem:[%s578_s5 + $0x38] sm:$0xff]  }
   0x8   :  { %398 = vmatprep.subr.bf16.mxu0 %v440_v0  ;;  %382 = vmatprep.subr.bf16.mxu1 %v440_v0  ;;  %v331_v29 = vld [vmem:[%s580_s4] ss:$0 sm:$0xff] }
   0x9   :  { %v340_v37 = vld [vmem:[%s581_s6] ss:$0 sm:$0xff] }
   0xa   :  { %375 = vmatmul.mubr.msk.bf16.vlgmr.msra.gmra.mrb[0].mxu0 %vm47_vm2, %v27_v6 }
   0xb   :  { %414 = vmatprep.mubr.msk.bf16.mxu0 %vm441_vm1, %v440_v0  ;;  %383 = vmatpush3.bf16.msra.mxu1 %v424_v7 }
   0xc   :  { %384 = vmatprep.subr.bf16.mxu1 %v440_v0  ;;  %399 = vmatpush3.bf16.msra.mxu0 %v430_v13 }
   0xd   :  { %400 = vmatprep.subr.bf16.mxu0 %v440_v0 }
   0xf   :  { %385 = vmatpush3.bf16.msra.mxu1 %v425_v8 }
  0x10   :  { %386 = vmatprep.subr.bf16.mxu1 %v440_v0  ;;  %401 = vmatpush3.bf16.msra.mxu0 %v431_v14 }
  0x11   :  { %402 = vmatprep.subr.bf16.mxu0 %v440_v0 }
  0x13   :  { %387 = vmatpush3.bf16.msra.mxu1 %v426_v9 }
  0x14   :  { %388 = vmatprep.subr.bf16.mxu1 %v440_v0  ;;  %403 = vmatpush3.bf16.msra.mxu0 %v432_v15 }
  0x15   :  { %404 = vmatprep.subr.bf16.mxu0 %v440_v0 }
  0x17   :  { %389 = vmatpush3.bf16.msra.mxu1 %v427_v10 }
  0x18   :  { %390 = vmatprep.subr.bf16.mxu1 %v440_v0  ;;  %405 = vmatpush3.bf16.msra.mxu0 %v433_v16 }
  0x19   :  { %406 = vmatprep.subr.bf16.mxu0 %v440_v0 }
  0x1b   :  { %391 = vmatpush3.bf16.msra.mxu1 %v428_v11 }
  0x1c   :  { %392 = vmatprep.subr.bf16.mxu1 %v440_v0  ;;  %407 = vmatpush3.bf16.msra.mxu0 %v434_v17 }
  0x1d   :  { %408 = vmatprep.subr.bf16.mxu0 %v440_v0 }
  0x1f   :  { %393 = vmatpush3.bf16.msra.mxu1 %v429_v12 }
  0x20   :  { %409 = vmatpush3.bf16.msra.mxu0 %v435_v18 }
  0x21   :  { %410 = vmatprep.subr.bf16.mxu0 %v440_v0 }
  0x24   :  { %411 = vmatpush3.bf16.msra.mxu0 %v436_v27 }
  0x25   :  { %412 = vmatprep.subr.bf16.mxu0 %v440_v0 }
  0x28   :  { %413 = vmatpush3.bf16.msra.mxu0 %v437_v28 }
  0xdd   :  { %v89_v20 = vpop.f32.mrb[0].mxu0 }
  0xde   :  { %v90_v21 = vadd.f32 %v327_v19, %v89_v20  ;;  %v376_v22 = vpop.f32.mrb[1].mxu0 }
  0xdf   :  { %v92_v23 = vpop.f32.mrb[2].mxu0 }
  0xe0   :  { %v95_v24 = vmax.f32 %v90_v21, 0.0  ;;  %v377_v25 = vpop.f32.mrb[3].mxu0 }
  0xe2   :  { %v96_v26 = vpack.c.bf16 %v95_v24, %v95_v24 }
  0xe4   :  { %395 = vmatmul.mubr.bf16.vlgmr.msra.gmra.mrb[0].mxu1 %v96_v26 }
 0x1b7   :  { %v202_v30 = vpop.f32.mrb[0].mxu1 }
 0x1b8   :  { %v203_v31 = vadd.f32 %v331_v29, %v202_v30  ;;  %v396_v32 = vpop.f32.mrb[1].mxu1 }
 0x1b9   :  { %v205_v33 = vpop.f32.mrb[2].mxu1 }
 0x1ba   :  { %v208_v34 = vmax.f32 %v203_v31, 0.0  ;;  %v397_v35 = vpop.f32.mrb[3].mxu1 }
 0x1bc   :  { %v209_v36 = vpack.c.bf16 %v208_v34, %v208_v34 }
 0x1be   :  { %415 = vmatmul.mubr.bf16.vlgmr.msra.gmra.mrb[4].mxu0 %v209_v36 }
 0x291   :  { %v315_v38 = vpop.f32.mrb[4].mxu0 }
 0x292   :  { %v316_v39 = vadd.f32 %v340_v37, %v315_v38  ;;  %v416_v40 = vpop.f32.mrb[5].mxu0 }
 0x293   :  { %v318_v41 = vpop.f32.mrb[6].mxu0 }
 0x294   :  { %438 = vtanh.f32 %v316_v39  ;;  %v417_v42 = vpop.f32.mrb[7].mxu0 }
 0x29e   :  { %v439_v43 = vpop.eup %438 }
 0x29f   :  { %322 = vst [vmem:[%s582_s7] sm:$0xff] %v439_v43 }

</bundles_post_ra>
